<compile_context>
chip_gen: v6e
topology: v6e:2x2x1
jax: 0.10.0
libtpu: 0.0.40
codegen_flags: <defaults>
</compile_context>

<pallas_src>
import jax
import jax.numpy as jnp
from jax.experimental import pallas as pl
from jax.experimental.pallas import tpu as pltpu


def fusion_kernel(wl_ref, wg_ref, lp_ref, gp_ref, bias_ref, o_ref):
    # (C_out, N) @ (N, T) + (C_out, N) @ (N, T) on the MXU, f32 accumulate.
    # W already carries the folded BatchNorm scale.
    acc = jnp.dot(wl_ref[...], lp_ref[...], preferred_element_type=jnp.float32)
    acc = acc + jnp.dot(wg_ref[...], gp_ref[...], preferred_element_type=jnp.float32)
    # Folded-BN bias + ReLU on the VPU.
    o_ref[...] = jnp.maximum(acc + bias_ref[...], 0.0).astype(o_ref.dtype)


def fusion_block_forward(local_patch, global_patch, params, *, tile_d=8192,
                         out_dtype=None):
    """Pallas forward of Fusion_Block.

    local_patch, global_patch: [N, D] each (conceptually concatenated along
    dim 0 -> C_in = 2N).  Returns [C_out, D].
    """
    w = params["weight"].astype(jnp.float32)        # [C_out, C_in]
    gamma = params["bn_gamma"].astype(jnp.float32)  # [C_out]
    beta = params["bn_beta"].astype(jnp.float32)    # [C_out]
    r_mean = params["bn_mean"].astype(jnp.float32)  # [C_out]
    r_var = params["bn_var"].astype(jnp.float32)    # [C_out]
    eps = params["bn_eps"]

    n, d = local_patch.shape
    assert global_patch.shape == (n, d)
    c_out, c_in = w.shape
    assert c_in == 2 * n
    out_dtype = local_patch.dtype if out_dtype is None else out_dtype

    # Fold BN (eval mode): scale into W (tiny one-time op, amortized over all
    # D tiles); bias stays as a per-output-channel add in the kernel epilogue.
    inv_std = 1.0 / jnp.sqrt(r_var + eps)
    scale = gamma * inv_std                                   # [C_out]
    bias = (beta - r_mean * scale).reshape(c_out, 1)          # [C_out, 1]
    w_scaled = w * scale[:, None]                             # [C_out, 2N]
    w_local = w_scaled[:, :n]                                 # [C_out, N]
    w_global = w_scaled[:, n:]                                # [C_out, N]

    # Tile selection: one grid step if D fits the VMEM budget (no padding, no
    # per-step overhead); otherwise the largest lane-dense (multiple-of-128)
    # tile that keeps the double-buffered working set under ~12 MiB, which is
    # safe under every generation's default scoped-VMEM limit (16 MiB v5e,
    # 32 MiB v6e/v7x).  No jnp.pad: each output column depends only on its own
    # input column, so the last partial block is just a masked tail store.
    itemsize = jnp.dtype(local_patch.dtype).itemsize
    vmem_budget = 12 * 1024 * 1024
    per_lane_bytes = 2 * (2 * n * itemsize + c_out * jnp.dtype(out_dtype).itemsize)
    tile_from_vmem = max(128, (vmem_budget // per_lane_bytes) // 128 * 128)
    tile_cap = max(128, min(tile_d, tile_from_vmem))
    if d <= tile_cap:
        tile = d           # single step, block == full array (no (8,128) issue)
    else:
        tile = tile_cap    # multiple of 128 -> lane-dense stores
    grid = (pl.cdiv(d, tile),)

    cost = pl.CostEstimate(
        flops=2 * c_out * c_in * d,
        transcendentals=0,
        bytes_accessed=(2 * n * d * itemsize                   # local + global
                        + c_out * d * jnp.dtype(out_dtype).itemsize
                        + (c_out * c_in + c_out) * 4),
    )

    out = pl.pallas_call(
        fusion_kernel,
        out_shape=jax.ShapeDtypeStruct((c_out, d), out_dtype),
        grid_spec=pltpu.PrefetchScalarGridSpec(
            num_scalar_prefetch=0,
            grid=grid,
            in_specs=[
                pl.BlockSpec((c_out, n), lambda j: (0, 0)),    # W_local (resident)
                pl.BlockSpec((c_out, n), lambda j: (0, 0)),    # W_global (resident)
                pl.BlockSpec((n, tile), lambda j: (0, j)),     # local patch lane-tile
                pl.BlockSpec((n, tile), lambda j: (0, j)),     # global patch lane-tile
                pl.BlockSpec((c_out, 1), lambda j: (0, 0)),    # folded-BN bias
            ],
            out_specs=pl.BlockSpec((c_out, tile), lambda j: (0, j)),
        ),
        compiler_params=pltpu.CompilerParams(
            dimension_semantics=("parallel",)),
        cost_estimate=cost,
    )(w_local, w_global, local_patch, global_patch, bias)

    return out


def reference_forward(local_patch, global_patch, params):
    x = jnp.concatenate([local_patch, global_patch], axis=0)
    w = params["weight"]
    y = w @ x
    scale = params["bn_gamma"] / jnp.sqrt(params["bn_var"] + params["bn_eps"])
    bias = params["bn_beta"] - params["bn_mean"] * scale
    y = y * scale[:, None] + bias[:, None]
    return jnp.maximum(y, 0.0)


if __name__ == "__main__":
    key = jax.random.PRNGKey(0)
    k_local, k_global, k_w, k_g, k_b, k_m, k_v = jax.random.split(key, 7)

    # Small shapes consistent with the forward:
    #   local/global patches: [N, D];  in_channel = 2N;  out_channel = C_out.
    # D = 1000 is not a multiple of 128, exercising the masked-tail-store /
    # single-grid-step path with no padding.
    N, D = 4, 1000
    C_in, C_out = 2 * N, 8

    local_patch = jax.random.normal(k_local, (N, D), dtype=jnp.float32)
    global_patch = jax.random.normal(k_global, (N, D), dtype=jnp.float32)

    params = {
        # Conv2d(in_channel, out_channel, 1, 1, 0, bias=False) -> weight [C_out, C_in]
        "weight": jax.random.normal(k_w, (C_out, C_in), dtype=jnp.float32) * 0.1,
        # BatchNorm2d(out_channel) params / running stats (deterministic init).
        "bn_gamma": 1.0 + 0.1 * jax.random.normal(k_g, (C_out,), dtype=jnp.float32),
        "bn_beta": 0.1 * jax.random.normal(k_b, (C_out,), dtype=jnp.float32),
        "bn_mean": 0.1 * jax.random.normal(k_m, (C_out,), dtype=jnp.float32),
        "bn_var": jnp.abs(1.0 + 0.1 * jax.random.normal(k_v, (C_out,), dtype=jnp.float32)),
        "bn_eps": 1e-5,
    }

    out = fusion_block_forward(local_patch, global_patch, params)
    out = jax.block_until_ready(out)

    ref = reference_forward(local_patch, global_patch, params)
    assert out.shape == (C_out, D)
    assert jnp.allclose(out, ref, atol=1e-5, rtol=1e-5), "mismatch vs reference"

    # Also exercise the multi-tile (tail-masked) path with a tiny forced tile.
    out2 = jax.block_until_ready(
        fusion_block_forward(local_patch, global_patch, params, tile_d=256))
    assert jnp.allclose(out2, ref, atol=1e-5, rtol=1e-5), "mismatch (tiled path)"

    print("KERNEL_OK")
</pallas_src>

<mosaic_0001>
module attributes {stable_mosaic.version = 11 : i64} {
  func.func @fusion_kernel(%arg0: i32, %arg1: memref<8x4xf32, #tpu.memory_space<vmem>>, %arg2: memref<8x4xf32, #tpu.memory_space<vmem>>, %arg3: memref<4x1000xf32, #tpu.memory_space<vmem>>, %arg4: memref<4x1000xf32, #tpu.memory_space<vmem>>, %arg5: memref<8x1xf32, #tpu.memory_space<vmem>>, %arg6: memref<8x1000xf32, #tpu.memory_space<vmem>>) attributes {dimension_semantics = [#tpu.dimension_semantics<parallel>], iteration_bounds = array<i64: 1>, scalar_prefetch = 0 : i64, scratch_operands = 0 : i64, tpu.core_type = #tpu.core_type<tc>, window_params = [{pipeline_mode = #tpu.pipeline_mode<synchronous>, transform_indices = @transform_0, window_bounds = array<i64: 8, 4>}, {pipeline_mode = #tpu.pipeline_mode<synchronous>, transform_indices = @transform_1, window_bounds = array<i64: 8, 4>}, {transform_indices = @transform_2, window_bounds = array<i64: 4, 1000>}, {transform_indices = @transform_3, window_bounds = array<i64: 4, 1000>}, {pipeline_mode = #tpu.pipeline_mode<synchronous>, transform_indices = @transform_4, window_bounds = array<i64: 8, 1>}, {transform_indices = @transform_5, window_bounds = array<i64: 8, 1000>}]} {
    %c0 = arith.constant 0 : index
    %c0_0 = arith.constant 0 : index
    %0 = vector.load %arg1[%c0, %c0_0] : memref<8x4xf32, #tpu.memory_space<vmem>>, vector<8x4xf32>
    %c0_1 = arith.constant 0 : index
    %c0_2 = arith.constant 0 : index
    %1 = vector.load %arg3[%c0_1, %c0_2] : memref<4x1000xf32, #tpu.memory_space<vmem>>, vector<4x1000xf32>
    %cst = arith.constant dense<0.000000e+00> : vector<8x1000xf32>
    %2 = tpu.matmul %0, %1, %cst {dimension_numbers = #tpu.dot_dimension_numbers<[1], [0], [0], [1], [0, 0, 1, 1], [], []>} : vector<8x4xf32>, vector<4x1000xf32>, vector<8x1000xf32> -> vector<8x1000xf32>
    %c0_3 = arith.constant 0 : index
    %c0_4 = arith.constant 0 : index
    %3 = vector.load %arg2[%c0_3, %c0_4] : memref<8x4xf32, #tpu.memory_space<vmem>>, vector<8x4xf32>
    %c0_5 = arith.constant 0 : index
    %c0_6 = arith.constant 0 : index
    %4 = vector.load %arg4[%c0_5, %c0_6] : memref<4x1000xf32, #tpu.memory_space<vmem>>, vector<4x1000xf32>
    %cst_7 = arith.constant dense<0.000000e+00> : vector<8x1000xf32>
    %5 = tpu.matmul %3, %4, %cst_7 {dimension_numbers = #tpu.dot_dimension_numbers<[1], [0], [0], [1], [0, 0, 1, 1], [], []>} : vector<8x4xf32>, vector<4x1000xf32>, vector<8x1000xf32> -> vector<8x1000xf32>
    %6 = arith.addf %2, %5 : vector<8x1000xf32>
    %c0_8 = arith.constant 0 : index
    %c0_9 = arith.constant 0 : index
    %7 = vector.load %arg5[%c0_8, %c0_9] : memref<8x1xf32, #tpu.memory_space<vmem>>, vector<8x1xf32>
    %8 = vector.broadcast %7 : vector<8x1xf32> to vector<8x1000xf32>
    %9 = arith.addf %6, %8 : vector<8x1000xf32>
    %cst_10 = arith.constant 0.000000e+00 : f32
    %10 = vector.broadcast %cst_10 : f32 to vector<8x1000xf32>
    %11 = arith.maximumf %9, %10 : vector<8x1000xf32>
    %c0_11 = arith.constant 0 : index
    %c0_12 = arith.constant 0 : index
    %12 = vector.load %arg6[%c0_11, %c0_12] : memref<8x1000xf32, #tpu.memory_space<vmem>>, vector<8x1000xf32>
    tpu.vector_store %arg6[%c0_11, %c0_12], %11 {strides = array<i32>} : memref<8x1000xf32, #tpu.memory_space<vmem>>, vector<8x1000xf32>,
    return
  }
  func.func @transform_0(%arg0: i32) -> (i32, i32) {
    %c0_i32 = arith.constant 0 : i32
    %c0_i32_0 = arith.constant 0 : i32
    %c0_i32_1 = arith.constant 0 : i32
    return %c0_i32, %c0_i32_0 : i32, i32
  }
  func.func @transform_1(%arg0: i32) -> (i32, i32) {
    %c0_i32 = arith.constant 0 : i32
    %c0_i32_0 = arith.constant 0 : i32
    %c0_i32_1 = arith.constant 0 : i32
    return %c0_i32, %c0_i32_0 : i32, i32
  }
  func.func @transform_2(%arg0: i32) -> (i32, i32) {
    %c0_i32 = arith.constant 0 : i32
    %c0_i32_0 = arith.constant 0 : i32
    return %c0_i32, %arg0 : i32, i32
  }
  func.func @transform_3(%arg0: i32) -> (i32, i32) {
    %c0_i32 = arith.constant 0 : i32
    %c0_i32_0 = arith.constant 0 : i32
    return %c0_i32, %arg0 : i32, i32
  }
  func.func @transform_4(%arg0: i32) -> (i32, i32) {
    %c0_i32 = arith.constant 0 : i32
    %c0_i32_0 = arith.constant 0 : i32
    %c0_i32_1 = arith.constant 0 : i32
    return %c0_i32, %c0_i32_0 : i32, i32
  }
  func.func @transform_5(%arg0: i32) -> (i32, i32) {
    %c0_i32 = arith.constant 0 : i32
    %c0_i32_0 = arith.constant 0 : i32
    return %c0_i32, %arg0 : i32, i32
  }
}

</mosaic_0001>

<bundles_post_ra>
// kernel: tpu_custom_call.1
= control target key start
LH: loop header
LB: loop body
LE: loop exit
PB: predicated region body
PF: predicated region fallthrough
CT: control target
= control target key end

     0   :  { %10 = vsyncpa [#allocation3], 0  ;;  %s879_s0 = inlined_call_operand.vmem [shape: f32[8,4], index: 0, kind: input, shape index: {}]   ;;  %s880_s1 = inlined_call_operand.vmem [shape: f32[8,4], index: 1, kind: input, shape index: {}]   ;;  %s881_s2 = inlined_call_operand.vmem [shape: f32[4,1000], index: 2, kind: input, shape index: {}]   ;;  %s882_s3 = inlined_call_operand.hbm [shape: f32[4,1000], index: 3, kind: input, shape index: {}]   ;;  %s883_s4 = inlined_call_operand.vmem [shape: f32[8,1], index: 4, kind: input, shape index: {}]   ;;  %s884_s5 = inlined_call_operand.hbm [shape: f32[8,1000], index: 5, kind: output, shape index: {}]  }
   0x1   :  { %11 = vsyncpa [#allocation4], 0  ;;  %s794_s18 = smov [#allocation2]  }
   0x2   :  { %s24_s19 = sshll.u32 %s794_s18, 4  ;;  %s25_s19 = int_to_ptr.vmem [resolvable:$true] %s24_s19 }
   0x3   :  { %s758_s20 = scalar_lea.vmem %s25_s19, 512  ;;  %p763_p1 = scmp.lt.s32.totalorder %s25_s19, %s25_s19 }
   0x4   :  { %p759_p0 = scmp.ne.s32.totalorder %s25_s19, %s758_s20  ;;  %p764_p2 = scmp.lt.s32.totalorder %s758_s20, %s758_s20 }
   0x6   :  { %p765_p3 = por %p764_p2, %p763_p1 }
   0x8   :  { %p766_p4 = pnand %p765_p3, %p759_p0 }
   0xa   :  { %769 = shalt.err (!%p766_p4)
}
   0xb   :  { %27 = dma.hbm_to_vmem [thread:$0]  %s882_s3, 512, %s25_s19, [#allocation3]  }
   0xc   :  { %790 = dma.done.wait [#allocation3], 512  }
   0xd   :  { %791 = vsyncadd [#allocation3], 4294966784  ;;  %v795_v0 = vmov 0.0   ;;  %v796_v1 = vmov 0   ;;  %v39_v2 = vld [vmem:[#allocation2] sm:$0xff]  ;;  %vm55_vm0 = vcmask 1043456  }
   0xe   :  { %136 = vmatprep.mubr.f32.mxu0 %v795_v0  ;;  %207 = vmatprep.mubr.f32.mxu1 %v795_v0  ;;  %v40_v3 = vld [vmem:[#allocation2 + $0x8] sm:$0xff]  ;;  %v47_v4 = vcombine.high %v39_v2, %v39_v2  ;;  %v41_v6 = vld [vmem:[#allocation2 + $0x10] sm:$0xff]  ;;  %v42_v7 = vld [vmem:[#allocation2 + $0x18] sm:$0xff]  ;;  %vm51_vm1 = vcmask 31744   ;;  %vm696_vm2 = vcmask 850944  }
   0xf   :  { %741 = vset.pattern.permute.xlu0 %v796_v1  ;;  %v48_v5 = vcombine.high %v40_v3, %v40_v3  ;;  %v38_v8 = vld [vmem:[%s880_s1] sm:$0xff]  ;;  %v49_v9 = vcombine.high %v41_v6, %v41_v6  ;;  %v50_v10 = vcombine.high %v42_v7, %v42_v7  ;;  %v35_v12 = vld [vmem:[%s881_s2 + $0x8] sm:$0xff]  ;;  %v36_v15 = vld [vmem:[%s881_s2 + $0x10] sm:$0xff] }
  0x10   :  { %713 = vmatprep.subr.msk.mxu0 %vm55_vm0, %v47_v4  ;;  %v34_v11 = vld [vmem:[%s881_s2] sm:$0xff]  ;;  %v361_v14 = vcombine.high %v35_v12, %v35_v12  ;;  %v37_v16 = vld [vmem:[%s881_s2 + $0x18] sm:$0xff]  ;;  %v362_v18 = vcombine.high %v36_v15, %v36_v15 }
  0x11   :  { %716 = vmatprep.subr.msk.mxu1 %vm55_vm0, %v48_v5  ;;  %714 = vmatpush1.msk.msra.mxu0 %vm55_vm0, %v39_v2  ;;  %v360_v13 = vcombine.high %v34_v11, %v34_v11  ;;  %v33_v17 = vld [vmem:[%s879_s0] sm:$0xff]  ;;  %v363_v19 = vcombine.high %v37_v16, %v37_v16 }
  0x12   :  { %717 = vmatpush1.msk.msra.mxu1 %vm55_vm0, %v40_v3  ;;  %715 = vmatmul.mubr.msk.f32.vlgmr.msra.gmra.mxu0 %vm51_vm1, %v38_v8  ;;  %v667_v20 = vld [vmem:[%s883_s4] sm:$0xff]  ;;  %s797_s4 = smov [#allocation5]  }
  0x13   :  { %718 = vmatmul.mubr.msk.f32.vlgmr.msra.gmra.mxu1 %vm51_vm1, %v38_v8  ;;  %719 = vmatprep.subr.msk.mxu0 %vm55_vm0, %v49_v9  ;;  %s704_s8 = sshll.u32 %s797_s4, 4  ;;  %s705_s8 = int_to_ptr.vmem [resolvable:$true] %s704_s8 }
  0x14   :  { %722 = vmatprep.subr.msk.mxu1 %vm55_vm0, %v50_v10  ;;  %720 = vmatpush1.msk.msra.mxu0 %vm55_vm0, %v41_v6  ;;  %s770_s9 = scalar_lea.vmem %s705_s8, 1024  ;;  %p775_p6 = scmp.lt.s32.totalorder %s705_s8, %s705_s8 }
  0x15   :  { %723 = vmatpush1.msk.msra.mxu1 %vm55_vm0, %v42_v7  ;;  %278 = vmatprep.mubr.f32.mxu0 %v795_v0  ;;  %p771_p5 = scmp.ne.s32.totalorder %s705_s8, %s770_s9  ;;  %p776_p7 = scmp.lt.s32.totalorder %s770_s9, %s770_s9 }
  0x16   :  { %349 = vmatprep.mubr.f32.mxu1 %v795_v0  ;;  %721 = vmatmul.mubr.msk.f32.vlgmr.msra.gmra.mxu0 %vm51_vm1, %v38_v8 }
  0x17   :  { %724 = vmatmul.mubr.msk.f32.vlgmr.msra.gmra.mxu1 %vm51_vm1, %v38_v8  ;;  %725 = vmatprep.subr.msk.mxu0 %vm55_vm0, %v360_v13  ;;  %p777_p8 = por %p776_p7, %p775_p6 }
  0x18   :  { %728 = vmatprep.subr.msk.mxu1 %vm55_vm0, %v361_v14  ;;  %726 = vmatpush1.msk.msra.mxu0 %vm55_vm0, %v34_v11 }
  0x19   :  { %729 = vmatpush1.msk.msra.mxu1 %vm55_vm0, %v35_v12  ;;  %447 = vmatprep.mubr.f32.mxu0 %v795_v0  ;;  %p778_p9 = pnand %p777_p8, %p771_p5 }
  0x1a   :  { %518 = vmatprep.mubr.f32.mxu1 %v795_v0  ;;  %727 = vmatmul.mubr.msk.f32.vlgmr.msra.gmra.mxu0 %vm51_vm1, %v33_v17 }
  0x1b   :  { %730 = vmatmul.mubr.msk.f32.vlgmr.msra.gmra.mxu1 %vm51_vm1, %v33_v17  ;;  %731 = vmatprep.subr.msk.mxu0 %vm55_vm0, %v362_v18 }
  0x1c   :  { %734 = vmatprep.subr.msk.mxu1 %vm55_vm0, %v363_v19  ;;  %732 = vmatpush1.msk.msra.mxu0 %vm55_vm0, %v36_v15 }
  0x1d   :  { %735 = vmatpush1.msk.msra.mxu1 %vm55_vm0, %v37_v16  ;;  %589 = vmatprep.mubr.f32.mxu0 %v795_v0 }
  0x1e   :  { %660 = vmatprep.mubr.f32.mxu1 %v795_v0  ;;  %733 = vmatmul.mubr.msk.f32.vlgmr.msra.gmra.mxu0 %vm51_vm1, %v33_v17 }
  0x1f   :  { %736 = vmatmul.mubr.msk.f32.vlgmr.msra.gmra.mxu1 %vm51_vm1, %v33_v17  ;;  %670 = vperm.xlu0 %741, %v667_v20  }
  0x9a   :  { %v671_v29 = vpop.permute.xlu0 %670 }
  0xd2   :  { %v138_v21 = vpop.f32.mrf.mxu0 }
  0xd3   :  { %v209_v22 = vpop.f32.mrf.mxu1 }
  0xd4   :  { %v140_v23 = vpop.f32.mrf.mxu0 }
  0xd5   :  { %v211_v24 = vpop.f32.mrf.mxu1 }
  0xd6   :  { %v280_v25 = vpop.f32.mrf.mxu0 }
  0xd7   :  { %v351_v26 = vpop.f32.mrf.mxu1 }
  0xd8   :  { %v282_v27 = vpop.f32.mrf.mxu0 }
  0xd9   :  { %v353_v28 = vpop.f32.mrf.mxu1 }
  0xda   :  { %v449_v30 = vpop.f32.mrf.mxu0 }
  0xdb   :  { %v520_v31 = vpop.f32.mrf.mxu1  ;;  %v450_v32 = vadd.f32 %v449_v30, %v138_v21 }
  0xdc   :  { %v521_v33 = vadd.f32 %v520_v31, %v209_v22  ;;  %v451_v34 = vpop.f32.mrf.mxu0 }
  0xdd   :  { %v522_v35 = vpop.f32.mrf.mxu1  ;;  %v673_v36 = vadd.f32 %v671_v29, %v450_v32  ;;  %v452_v38 = vadd.f32 %v451_v34, %v140_v23 }
  0xde   :  { %v675_v37 = vadd.f32 %v671_v29, %v521_v33  ;;  %v523_v39 = vadd.f32 %v522_v35, %v211_v24  ;;  %v591_v40 = vpop.f32.mrf.mxu0 }
  0xdf   :  { %v662_v41 = vpop.f32.mrf.mxu1  ;;  %v681_v42 = vmax.f32 %v673_v36, 0.0  ;;  %v674_v44 = vadd.f32 %v671_v29, %v452_v38  ;;  %v592_v46 = vadd.f32 %v591_v40, %v280_v25 }
  0xe0   :  { %v683_v43 = vmax.f32 %v675_v37, 0.0  ;;  %v676_v45 = vadd.f32 %v671_v29, %v523_v39  ;;  %v663_v47 = vadd.f32 %v662_v41, %v351_v26  ;;  %v593_v48 = vpop.f32.mrf.mxu0 }
  0xe1   :  { %v664_v49 = vpop.f32.mrf.mxu1  ;;  %689 = vst [vmem:[#allocation5] sm:$0xff] %v681_v42  ;;  %v682_v50 = vmax.f32 %v674_v44, 0.0  ;;  %v594_v52 = vadd.f32 %v593_v48, %v282_v27  ;;  %v677_v54 = vadd.f32 %v671_v29, %v592_v46 }
  0xe2   :  { %691 = vst [vmem:[#allocation5 + $0x10] sm:$0xff] %v683_v43  ;;  %v684_v51 = vmax.f32 %v676_v45, 0.0  ;;  %v665_v53 = vadd.f32 %v664_v49, %v353_v28  ;;  %v679_v55 = vadd.f32 %v671_v29, %v663_v47 }
  0xe3   :  { %690 = vst [vmem:[#allocation5 + $0x8] sm:$0xff] %v682_v50  ;;  %v678_v56 = vadd.f32 %v671_v29, %v594_v52  ;;  %v685_v58 = vmax.f32 %v677_v54, 0.0 }
  0xe4   :  { %692 = vst [vmem:[#allocation5 + $0x18] sm:$0xff] %v684_v51  ;;  %v680_v57 = vadd.f32 %v671_v29, %v665_v53  ;;  %v687_v59 = vmax.f32 %v679_v55, 0.0 }
  0xe5   :  { %v686_v60 = vmax.f32 %v678_v56, 0.0  ;;  %693 = vst [vmem:[#allocation5 + $0x20] sm:$0xff] %v685_v58 }
  0xe6   :  { %v688_v61 = vmax.f32 %v680_v57, 0.0  ;;  %695 = vst [vmem:[#allocation5 + $0x30] sm:$0xff] %v687_v59 }
  0xe7   :  { %694 = vst [vmem:[#allocation5 + $0x28] sm:$0xff] %v686_v60 }
  0xe8   :  { %697 = vst.msk [vmem:[#allocation5 + $0x38] sm:$0xff] %vm696_vm2, %v688_v61 }
  0xe9   :  { %781 = shalt.err (!%p778_p9)
}
  0xea   :  { %707 = dma.vmem_to_hbm [thread:$0]  %s705_s8, 1024, %s884_s5, [#allocation4]  }
  0xeb   :  { %792 = dma.done.wait [#allocation4], 1024  }
  0xec   :  { %793 = vsyncadd [#allocation4], 4294966272 }
  0xed   :  { %711 = vsyncpa [#allocation3], 1 }
  0xee   :  { %712 = vsyncpa [#allocation4], 1 }

</bundles_post_ra>
